<compile_context>
chip_gen: v6e
topology: v6e:2x2x1
jax: 0.10.0
libtpu: 0.0.40
codegen_flags: <defaults>
</compile_context>

<pallas_src>
import functools
import math

import jax
import jax.numpy as jnp
from jax.experimental import pallas as pl
from jax.experimental.pallas import tpu as pltpu


# ----------------------------------------------------------------------------- helpers

_LANE = 128                      # keep the output feature dim a multiple of the lane width
_SUBLANE = 8                     # batch-tile rows are a multiple of the sublane count
_DEFAULT_TILE_ROWS = 512         # conservative tile: fits easily in v7x's 64 MiB VMEM
_VMEM_LIMIT = 32 * 1024 * 1024   # explicit scoped-VMEM ceiling, safe on v5e/v6e/v7x


def _round_up(x: int, m: int) -> int:
    return (x + m - 1) // m * m


def _pick_tiling(n: int, max_rows: int):
    tm = min(_round_up(max_rows, _SUBLANE), _round_up(n, _SUBLANE))
    n_pad = _round_up(n, tm)
    return tm, n_pad


# ----------------------------------------------------------------------------- kernels

def _fc_relu_kernel(x_ref, w_ref, b_ref, *rest, threshold, keep_scale):
    """One batch tile of relu(x @ W + b), optionally followed by L2-preserved dropout.

    BatchNorm (running stats in eval, batch stats in training) is pre-folded into
    (W, b) by the wrapper, so the same kernel body serves both modes.
    """
    if threshold is None:
        (o_ref,) = rest
        bits_ref = None
    else:
        bits_ref, o_ref = rest

    f = jnp.dot(x_ref[...], w_ref[...], preferred_element_type=jnp.float32)
    f = f + b_ref[...]
    f = jnp.maximum(f, 0.0)

    if threshold is not None:
        # Uniform int32 bits >= signed threshold  <=>  keep with probability (1 - p).
        keep = bits_ref[...] >= jnp.int32(threshold)
        f = jnp.where(keep, f * jnp.float32(keep_scale), 0.0)

    o_ref[...] = f.astype(o_ref.dtype)


def _batch_stats_kernel(x_ref, w_ref, b_ref, sum_ref, sumsq_ref, *, n_valid, tile_rows):
    """Accumulate per-feature sum and sum-of-squares of f = x @ W + b over batch tiles."""
    i = pl.program_id(0)

    @pl.when(i == 0)
    def _init():
        sum_ref[...] = jnp.zeros_like(sum_ref)
        sumsq_ref[...] = jnp.zeros_like(sumsq_ref)

    f = jnp.dot(x_ref[...], w_ref[...], preferred_element_type=jnp.float32)
    f = f + b_ref[...]

    # Mask rows that are batch padding so they do not pollute the statistics.
    row = jax.lax.broadcasted_iota(jnp.int32, f.shape, 0) + i * tile_rows
    f = jnp.where(row < n_valid, f, 0.0)

    sum_ref[...] += jnp.sum(f, axis=0, keepdims=True)
    sumsq_ref[...] += jnp.sum(f * f, axis=0, keepdims=True)


# ----------------------------------------------------------------------------- launchers

def _run_fc_relu(x, w, b, bits, *, threshold, keep_scale, max_rows, use_bf16):
    n, k = x.shape
    d = w.shape[1]
    d_pad = _round_up(d, _LANE)
    tm, n_pad = _pick_tiling(n, max_rows)

    mxu_dtype = jnp.bfloat16 if use_bf16 else jnp.float32
    x_p = jnp.pad(x, ((0, n_pad - n), (0, 0))).astype(mxu_dtype)
    w_p = jnp.pad(w, ((0, 0), (0, d_pad - d))).astype(mxu_dtype)
    b_p = jnp.pad(b.reshape(1, d), ((0, 0), (0, d_pad - d))).astype(jnp.float32)

    in_specs = [
        pl.BlockSpec((tm, k), lambda i: (i, 0)),      # streamed batch tile
        pl.BlockSpec((k, d_pad), lambda i: (0, 0)),   # weights: VMEM-resident
        pl.BlockSpec((1, d_pad), lambda i: (0, 0)),   # folded bias: VMEM-resident
    ]
    args = [x_p, w_p, b_p]
    if threshold is not None:
        bits_p = jnp.pad(bits, ((0, n_pad - n), (0, d_pad - d)))
        in_specs.append(pl.BlockSpec((tm, d_pad), lambda i: (i, 0)))
        args.append(bits_p)

    kernel = functools.partial(_fc_relu_kernel, threshold=threshold, keep_scale=keep_scale)
    out = pl.pallas_call(
        kernel,
        grid=(n_pad // tm,),
        in_specs=in_specs,
        out_specs=pl.BlockSpec((tm, d_pad), lambda i: (i, 0)),
        out_shape=jax.ShapeDtypeStruct((n_pad, d_pad), jnp.float32),
        compiler_params=pltpu.CompilerParams(
            dimension_semantics=("parallel",),   # batch tiles independent -> megacore-shardable
            vmem_limit_bytes=_VMEM_LIMIT,
        ),
    )(*args)
    return out[:n, :d]


def _run_batch_stats(x, w, b, *, max_rows, use_bf16):
    n, k = x.shape
    d = w.shape[1]
    d_pad = _round_up(d, _LANE)
    tm, n_pad = _pick_tiling(n, max_rows)

    mxu_dtype = jnp.bfloat16 if use_bf16 else jnp.float32
    x_p = jnp.pad(x, ((0, n_pad - n), (0, 0))).astype(mxu_dtype)
    w_p = jnp.pad(w, ((0, 0), (0, d_pad - d))).astype(mxu_dtype)
    b_p = jnp.pad(b.reshape(1, d), ((0, 0), (0, d_pad - d))).astype(jnp.float32)

    kernel = functools.partial(_batch_stats_kernel, n_valid=n, tile_rows=tm)
    sum_f, sumsq_f = pl.pallas_call(
        kernel,
        grid=(n_pad // tm,),
        in_specs=[
            pl.BlockSpec((tm, k), lambda i: (i, 0)),
            pl.BlockSpec((k, d_pad), lambda i: (0, 0)),
            pl.BlockSpec((1, d_pad), lambda i: (0, 0)),
        ],
        out_specs=[
            pl.BlockSpec((1, d_pad), lambda i: (0, 0)),   # resident accumulators
            pl.BlockSpec((1, d_pad), lambda i: (0, 0)),
        ],
        out_shape=[
            jax.ShapeDtypeStruct((1, d_pad), jnp.float32),
            jax.ShapeDtypeStruct((1, d_pad), jnp.float32),
        ],
        compiler_params=pltpu.CompilerParams(
            dimension_semantics=("arbitrary",),   # reduction over batch tiles
            vmem_limit_bytes=_VMEM_LIMIT,
        ),
    )(x_p, w_p, b_p)
    return sum_f[:, :d], sumsq_f[:, :d]


# ----------------------------------------------------------------------------- forwards

def block_forward_eval(x, weight_t, bias, gamma, beta, running_mean, running_var,
                       *, eps=1e-5, max_rows_per_tile=_DEFAULT_TILE_ROWS, use_bf16=True):
    """Inference forward: BN (running stats) folded into the matmul; dropout = identity."""
    scale = gamma * jax.lax.rsqrt(running_var + eps)     # [1, D]
    w_f = weight_t * scale                               # fold BN scale into FC weight columns
    b_f = (bias - running_mean) * scale + beta           # fold BN shift into FC bias
    return _run_fc_relu(x, w_f, b_f, None, threshold=None, keep_scale=1.0,
                        max_rows=max_rows_per_tile, use_bf16=use_bf16)


def block_forward_train(x, weight_t, bias, gamma, beta, running_mean, running_var,
                        *, rng_key, dropout_p=0.5, eps=1e-5, momentum=0.1,
                        max_rows_per_tile=_DEFAULT_TILE_ROWS, use_bf16=True):
    """Training forward. Returns (y, new_running_mean, new_running_var)."""
    n, _ = x.shape
    d = weight_t.shape[1]

    # Pass 1: full-batch statistics of f = x @ W + b (tiled accumulation kernel).
    sum_f, sumsq_f = _run_batch_stats(x, weight_t, bias,
                                      max_rows=max_rows_per_tile, use_bf16=use_bf16)
    mean = sum_f / n
    var = jnp.maximum(sumsq_f / n - mean * mean, 0.0)    # biased batch variance (BN forward)

    # Fold batch-stat BN into the matmul, exactly as in eval mode.
    scale = gamma * jax.lax.rsqrt(var + eps)
    w_f = weight_t * scale
    b_f = (bias - mean) * scale + beta

    # L2-preserved dropout: keep with prob (1-p), kept units scaled by 1/sqrt(1-p)
    # (= nn.Dropout's 1/(1-p) times the module's explicit sqrt(1-p)).
    if dropout_p > 0.0:
        threshold_u32 = min(int(round(dropout_p * 2.0 ** 32)), 2 ** 32 - 1)
        threshold = threshold_u32 - 2 ** 31            # signed int32 threshold
        keep_scale = 1.0 / math.sqrt(1.0 - dropout_p)
        # TODO(synk): random bits are generated host-side with jax.random because the
        # in-kernel hardware PRNG (pltpu.prng_seed/prng_random_bits) has no interpret/CPU lowering.
        bits = jax.lax.bitcast_convert_type(
            jax.random.bits(rng_key, (n, d), dtype=jnp.uint32), jnp.int32)
    else:
        threshold, keep_scale, bits = None, 1.0, None

    y = _run_fc_relu(x, w_f, b_f, bits, threshold=threshold, keep_scale=keep_scale,
                     max_rows=max_rows_per_tile, use_bf16=use_bf16)

    # PyTorch BatchNorm1d running-stat update (uses unbiased variance) — tiny [1, D] math.
    var_unbiased = var * (n / max(n - 1, 1))
    new_rm = (1.0 - momentum) * running_mean + momentum * mean
    new_rv = (1.0 - momentum) * running_var + momentum * var_unbiased
    return y, new_rm, new_rv


# ----------------------------------------------------------------------------- demo / checks

if __name__ == "__main__":
    N, IN_F, BOTTLENECK = 32, 32, 128
    DROPOUT_P = 0.5
    EPS = 1e-5

    key = jax.random.PRNGKey(0)
    kx, kw, kb, kv, kdrop = jax.random.split(key, 5)

    x = jax.random.normal(kx, (N, IN_F), dtype=jnp.float32)

    bound = 1.0 / math.sqrt(IN_F)
    weight = jax.random.uniform(kw, (BOTTLENECK, IN_F), jnp.float32, -bound, bound)
    bias = jax.random.uniform(kb, (1, BOTTLENECK), jnp.float32, -bound, bound)
    weight_t = weight.T  # [IN_F, BOTTLENECK]

    gamma = jnp.ones((1, BOTTLENECK), jnp.float32)
    beta = jnp.zeros((1, BOTTLENECK), jnp.float32)
    running_mean = jnp.zeros((1, BOTTLENECK), jnp.float32)
    running_var = 0.5 + jax.random.uniform(kv, (1, BOTTLENECK), jnp.float32)

    # ------------------------- eval mode -------------------------
    y_eval = block_forward_eval(x, weight_t, bias, gamma, beta, running_mean,
                                running_var, eps=EPS, use_bf16=False)
    jax.block_until_ready(y_eval)

    f_ref = x @ weight_t + bias
    f_ref = (f_ref - running_mean) * jax.lax.rsqrt(running_var + EPS) * gamma + beta
    eval_ref = jnp.maximum(f_ref, 0.0)
    assert jnp.allclose(y_eval, eval_ref, atol=2e-2, rtol=1e-2), "eval (f32) mismatch"

    y_eval_bf16 = block_forward_eval(x, weight_t, bias, gamma, beta, running_mean,
                                     running_var, eps=EPS, use_bf16=True)
    jax.block_until_ready(y_eval_bf16)
    assert jnp.allclose(y_eval_bf16, eval_ref, atol=6e-2, rtol=5e-2), "eval (bf16) mismatch"

    # ------------------------- training mode -------------------------
    y_train, new_rm, new_rv = block_forward_train(
        x, weight_t, bias, gamma, beta, running_mean, running_var,
        rng_key=kdrop, dropout_p=DROPOUT_P, eps=EPS, use_bf16=False)
    jax.block_until_ready(y_train)

    # Pure-JAX reference (module semantics), sharing the host-generated dropout bits.
    f = x @ weight_t + bias
    mean = jnp.mean(f, axis=0, keepdims=True)
    var = jnp.mean((f - mean) ** 2, axis=0, keepdims=True)
    f = (f - mean) * jax.lax.rsqrt(var + EPS) * gamma + beta
    f = jnp.maximum(f, 0.0)
    bits_ref = jax.lax.bitcast_convert_type(
        jax.random.bits(kdrop, (N, BOTTLENECK), dtype=jnp.uint32), jnp.int32)
    thr = min(int(round(DROPOUT_P * 2.0 ** 32)), 2 ** 32 - 1) - 2 ** 31
    keep = bits_ref >= jnp.int32(thr)
    train_ref = jnp.where(keep, f / math.sqrt(1.0 - DROPOUT_P), 0.0)

    assert jnp.allclose(y_train, train_ref, atol=2e-2, rtol=1e-2), "train (f32) mismatch"
    assert bool(jnp.all(jnp.isfinite(new_rm))) and bool(jnp.all(jnp.isfinite(new_rv)))

    # Optimized bf16 training path (loose check: bf16 MXU inputs).
    y_train_bf16, _, _ = block_forward_train(
        x, weight_t, bias, gamma, beta, running_mean, running_var,
        rng_key=kdrop, dropout_p=DROPOUT_P, eps=EPS, use_bf16=True)
    jax.block_until_ready(y_train_bf16)
    assert jnp.allclose(y_train_bf16, train_ref, atol=1e-1, rtol=5e-2), "train (bf16) mismatch"

    print("KERNEL_OK")
</pallas_src>

<mosaic_0001>
module attributes {stable_mosaic.version = 11 : i64} {
  func.func @_fc_relu_kernel(%arg0: i32, %arg1: memref<32x32xf32, #tpu.memory_space<vmem>>, %arg2: memref<32x128xf32, #tpu.memory_space<vmem>>, %arg3: memref<1x128xf32, #tpu.memory_space<vmem>>, %arg4: memref<32x128xf32, #tpu.memory_space<vmem>>) attributes {dimension_semantics = [#tpu.dimension_semantics<parallel>], iteration_bounds = array<i64: 1>, scalar_prefetch = 0 : i64, scratch_operands = 0 : i64, tpu.core_type = #tpu.core_type<tc>, window_params = [{transform_indices = @transform_0, window_bounds = array<i64: 32, 32>}, {pipeline_mode = #tpu.pipeline_mode<synchronous>, transform_indices = @transform_1, window_bounds = array<i64: 32, 128>}, {pipeline_mode = #tpu.pipeline_mode<synchronous>, transform_indices = @transform_2, window_bounds = array<i64: 1, 128>}, {transform_indices = @transform_3, window_bounds = array<i64: 32, 128>}]} {
    %c0 = arith.constant 0 : index
    %c0_0 = arith.constant 0 : index
    %0 = vector.load %arg1[%c0, %c0_0] : memref<32x32xf32, #tpu.memory_space<vmem>>, vector<32x32xf32>
    %c0_1 = arith.constant 0 : index
    %c0_2 = arith.constant 0 : index
    %1 = vector.load %arg2[%c0_1, %c0_2] : memref<32x128xf32, #tpu.memory_space<vmem>>, vector<32x128xf32>
    %cst = arith.constant dense<0.000000e+00> : vector<32x128xf32>
    %2 = tpu.matmul %0, %1, %cst {dimension_numbers = #tpu.dot_dimension_numbers<[1], [0], [0], [1], [0, 0, 1, 1], [], []>} : vector<32x32xf32>, vector<32x128xf32>, vector<32x128xf32> -> vector<32x128xf32>
    %c0_3 = arith.constant 0 : index
    %c0_4 = arith.constant 0 : index
    %3 = vector.load %arg3[%c0_3, %c0_4] : memref<1x128xf32, #tpu.memory_space<vmem>>, vector<1x128xf32>
    %4 = vector.broadcast %3 : vector<1x128xf32> to vector<32x128xf32>
    %5 = arith.addf %2, %4 : vector<32x128xf32>
    %cst_5 = arith.constant 0.000000e+00 : f32
    %6 = vector.broadcast %cst_5 : f32 to vector<32x128xf32>
    %7 = arith.maximumf %5, %6 : vector<32x128xf32>
    %c0_6 = arith.constant 0 : index
    %c0_7 = arith.constant 0 : index
    %8 = vector.load %arg4[%c0_6, %c0_7] : memref<32x128xf32, #tpu.memory_space<vmem>>, vector<32x128xf32>
    tpu.vector_store %arg4[%c0_6, %c0_7], %7 {strides = array<i32>} : memref<32x128xf32, #tpu.memory_space<vmem>>, vector<32x128xf32>,
    return
  }
  func.func @transform_0(%arg0: i32) -> (i32, i32) {
    %c0_i32 = arith.constant 0 : i32
    %c0_i32_0 = arith.constant 0 : i32
    return %arg0, %c0_i32 : i32, i32
  }
  func.func @transform_1(%arg0: i32) -> (i32, i32) {
    %c0_i32 = arith.constant 0 : i32
    %c0_i32_0 = arith.constant 0 : i32
    %c0_i32_1 = arith.constant 0 : i32
    return %c0_i32, %c0_i32_0 : i32, i32
  }
  func.func @transform_2(%arg0: i32) -> (i32, i32) {
    %c0_i32 = arith.constant 0 : i32
    %c0_i32_0 = arith.constant 0 : i32
    %c0_i32_1 = arith.constant 0 : i32
    return %c0_i32, %c0_i32_0 : i32, i32
  }
  func.func @transform_3(%arg0: i32) -> (i32, i32) {
    %c0_i32 = arith.constant 0 : i32
    %c0_i32_0 = arith.constant 0 : i32
    return %arg0, %c0_i32 : i32, i32
  }
}

</mosaic_0001>

<bundles_post_ra>
// kernel: tpu_custom_call.1
= control target key start
LH: loop header
LB: loop body
LE: loop exit
PB: predicated region body
PF: predicated region fallthrough
CT: control target
= control target key end

     0   :  { %8 = vsyncpa [#allocation3], 0  ;;  %s334_s0 = inlined_call_operand.hbm [shape: f32[32,32], index: 0, kind: input, shape index: {}]   ;;  %s335_s1 = inlined_call_operand.hbm [shape: f32[32,128], index: 1, kind: input, shape index: {}]   ;;  %s336_s2 = inlined_call_operand.vmem [shape: f32[1,128], index: 2, kind: input, shape index: {}]   ;;  %s337_s3 = inlined_call_operand.hbm [shape: f32[32,128], index: 3, kind: output, shape index: {}]  }
   0x1   :  { %9 = vsyncpa [#allocation6], 0 }
   0x2   :  { %10 = vsyncpa [#allocation4], 0  ;;  %s288_s12 = smov [#allocation2]  }
   0x3   :  { %s16_s13 = sshll.u32 %s288_s12, 4  ;;  %s17_s13 = int_to_ptr.vmem [resolvable:$true] %s16_s13 }
   0x4   :  { %s230_s14 = scalar_lea.vmem %s17_s13, 512  ;;  %p235_p1 = scmp.lt.s32.totalorder %s17_s13, %s17_s13 }
   0x5   :  { %p231_p0 = scmp.ne.s32.totalorder %s17_s13, %s230_s14  ;;  %p236_p2 = scmp.lt.s32.totalorder %s230_s14, %s230_s14 }
   0x7   :  { %p237_p3 = por %p236_p2, %p235_p1 }
   0x9   :  { %p238_p4 = pnand %p237_p3, %p231_p0 }
   0xb   :  { %241 = shalt.err (!%p238_p4)
}
   0xc   :  { %s289_s15 = smov 128   ;;  %s290_s16 = smov 8  }
   0xd   :  { %22 = dma.hbm_to_vmem [thread:$0]  %s334_s0, 512, %s17_s13, [#allocation3], %s289_s15, %s289_s15, %s290_s16  }
   0xe   :  { %s291_s19 = smov [#allocation5]  }
   0xf   :  { %s28_s20 = sshll.u32 %s291_s19, 4  ;;  %s29_s20 = int_to_ptr.vmem [resolvable:$true] %s28_s20 }
  0x10   :  { %s250_s21 = scalar_lea.vmem %s29_s20, 512  ;;  %p255_p6 = scmp.lt.s32.totalorder %s29_s20, %s29_s20 }
  0x11   :  { %p251_p5 = scmp.ne.s32.totalorder %s29_s20, %s250_s21  ;;  %p256_p7 = scmp.lt.s32.totalorder %s250_s21, %s250_s21 }
  0x13   :  { %p257_p8 = por %p256_p7, %p255_p6 }
  0x15   :  { %p258_p9 = pnand %p257_p8, %p251_p5 }
  0x17   :  { %261 = shalt.err (!%p258_p9)
}
  0x18   :  { %34 = dma.hbm_to_vmem [thread:$0]  %s335_s1, 512, %s29_s20, [#allocation6], %s289_s15, %s289_s15, %s290_s16  }
  0x19   :  { %282 = dma.done.wait [#allocation3], 512  }
  0x1a   :  { %283 = vsyncadd [#allocation3], 4294966784 }
  0x1b   :  { %284 = dma.done.wait [#allocation6], 512  }
  0x1c   :  { %285 = vsyncadd [#allocation6], 4294966784  ;;  %v50_v0 = vld [vmem:[#allocation5 + $0x18] sm:$0xff]  ;;  %v49_v1 = vld [vmem:[#allocation5 + $0x10] sm:$0xff]  ;;  %vm58_vm0 = vcmask 261120   ;;  %s292_s24 = smov [#allocation7]  }
  0x1d   :  { %195 = vmatprep.subr.mxu0 %v50_v0  ;;  %209 = vmatprep.subr.mxu1 %v50_v0  ;;  %v48_v2 = vld [vmem:[#allocation5 + $0x8] sm:$0xff]  ;;  %v47_v3 = vld [vmem:[#allocation5] sm:$0xff]  ;;  %v45_v5 = vld [vmem:[#allocation2 + $0x10] sm:$0xff]  ;;  %s169_s25 = sshll.u32 %s292_s24, 4  ;;  %s170_s25 = int_to_ptr.vmem [resolvable:$true] %s169_s25 }
  0x1e   :  { %196 = vmatpush3.msra.mxu0 %v50_v0  ;;  %213 = vmatpush3.msra.mxu1 %v50_v0  ;;  %v43_v4 = vld [vmem:[#allocation2] sm:$0xff]  ;;  %v44_v6 = vld [vmem:[#allocation2 + $0x8] sm:$0xff]  ;;  %v46_v7 = vld [vmem:[#allocation2 + $0x18] sm:$0xff]  ;;  %p267_p11 = scmp.lt.s32.totalorder %s170_s25, %s170_s25 }
  0x1f   :  { %197 = vmatprep.subr.mxu0 %v49_v1  ;;  %210 = vmatprep.subr.mxu1 %v49_v1  ;;  %v182_v8 = vld [vmem:[%s336_s2] ss:$0 sm:$0xff]  ;;  %s262_s2 = scalar_lea.vmem %s170_s25, 512 }
  0x20   :  { %198 = vmatpush3.msra.mxu0 %v49_v1  ;;  %214 = vmatpush3.msra.mxu1 %v49_v1  ;;  %p263_p10 = scmp.ne.s32.totalorder %s170_s25, %s262_s2  ;;  %p268_p12 = scmp.lt.s32.totalorder %s262_s2, %s262_s2 }
  0x21   :  { %199 = vmatprep.subr.mxu0 %v48_v2  ;;  %211 = vmatprep.subr.mxu1 %v48_v2 }
  0x22   :  { %200 = vmatpush3.msra.mxu0 %v48_v2  ;;  %215 = vmatpush3.msra.mxu1 %v48_v2  ;;  %p269_p13 = por %p268_p12, %p267_p11 }
  0x23   :  { %201 = vmatprep.subr.mxu0 %v47_v3  ;;  %212 = vmatprep.subr.mxu1 %v47_v3 }
  0x24   :  { %202 = vmatpush3.msra.mxu0 %v47_v3  ;;  %216 = vmatpush3.msra.mxu1 %v47_v3  ;;  %p270_p0 = pnand %p269_p13, %p263_p10 }
  0x25   :  { %203 = vmatprep.mubr.msk.f32.mxu0 %vm58_vm0, %v43_v4  ;;  %206 = vmatprep.mubr.msk.f32.mxu1 %vm58_vm0, %v45_v5 }
  0x26   :  { %204 = vmatmul.mubr.msk.f32.vlgmr.msra.gmra.mxu0 %vm58_vm0, %v44_v6  ;;  %207 = vmatmul.mubr.msk.f32.vlgmr.msra.gmra.mxu1 %vm58_vm0, %v46_v7 }
  0xe6   :  { %v205_v9 = vpop.f32.mrf.mxu0  ;;  %v208_v10 = vpop.f32.mrf.mxu1 }
  0xe7   :  { %v143_v11 = vadd.f32 %v205_v9, %v182_v8  ;;  %v153_v12 = vadd.f32 %v208_v10, %v182_v8 }
  0xe8   :  { %v137_v13 = vpop.f32.mrf.mxu0  ;;  %v147_v14 = vpop.f32.mrf.mxu1 }
  0xe9   :  { %v157_v15 = vmax.f32 %v143_v11, 0.0  ;;  %v159_v16 = vmax.f32 %v153_v12, 0.0  ;;  %v138_v17 = vadd.f32 %v182_v8, %v137_v13  ;;  %v148_v18 = vadd.f32 %v182_v8, %v147_v14 }
  0xeb   :  { %161 = vst [vmem:[#allocation7 + $0x8] sm:$0xff] %v157_v15  ;;  %163 = vst [vmem:[#allocation7 + $0x18] sm:$0xff] %v159_v16  ;;  %v156_v19 = vmax.f32 %v138_v17, 0.0  ;;  %v158_v20 = vmax.f32 %v148_v18, 0.0 }
  0xed   :  { %160 = vst [vmem:[#allocation7] sm:$0xff] %v156_v19  ;;  %162 = vst [vmem:[#allocation7 + $0x10] sm:$0xff] %v158_v20 }
  0xee   :  { %273 = shalt.err (!%p270_p0)
}
  0xef   :  { %175 = dma.vmem_to_hbm [thread:$0]  %s170_s25, 512, %s337_s3, [#allocation4], %s289_s15, %s289_s15, %s290_s16  }
  0xf0   :  { %286 = dma.done.wait [#allocation4], 512  }
  0xf1   :  { %287 = vsyncadd [#allocation4], 4294966784 }
  0xf2   :  { %179 = vsyncpa [#allocation3], 1 }
  0xf3   :  { %180 = vsyncpa [#allocation6], 1 }
  0xf4   :  { %181 = vsyncpa [#allocation4], 1 }

</bundles_post_ra>
